<compile_context>
chip_gen: v5e
topology: v5e:2x2
jax: 0.10.0
libtpu: 0.0.40
codegen_flags: <defaults>
</compile_context>

<pallas_src>
import jax
import jax.numpy as jnp
from jax import lax
from jax.experimental import pallas as pl
from jax.experimental.pallas import tpu as pltpu

_EPS = 1e-8  # torch.nn.functional.cosine_similarity default eps


def _round_up(v: int, m: int) -> int:
    return (v + m - 1) // m * m


def _make_kernel(t_total: int, tile_t: int, mask_t: bool):
    def kernel(x_ref, y_ref, cos_ref, dot_acc, nx_acc, ny_acc):
        t = pl.program_id(1)

        @pl.when(t == 0)
        def _():
            dot_acc[...] = jnp.zeros_like(dot_acc)
            nx_acc[...] = jnp.zeros_like(nx_acc)
            ny_acc[...] = jnp.zeros_like(ny_acc)

        x = x_ref[...].astype(jnp.float32)
        y = y_ref[...].astype(jnp.float32)

        if mask_t:
            # Zero out lanes beyond the true feature length T so the padded
            # (unspecified) block contents cannot corrupt the reductions.
            col = lax.broadcasted_iota(jnp.int32, x.shape, 1) + t * tile_t
            valid = col < t_total
            x = jnp.where(valid, x, 0.0)
            y = jnp.where(valid, y, 0.0)

        # Per-tile body: 3 VPU muls + 3 lane reductions; hides under the DMA.
        dot_acc[...] += jnp.sum(x * y, axis=1, keepdims=True)
        nx_acc[...] += jnp.sum(x * x, axis=1, keepdims=True)
        ny_acc[...] += jnp.sum(y * y, axis=1, keepdims=True)

        @pl.when(t == pl.num_programs(1) - 1)
        def _():
            # cos = dot / max(|x||y|, eps) == dot * rsqrt(max(|x|^2|y|^2, eps^2))
            denom_sq = jnp.maximum(nx_acc[...] * ny_acc[...], _EPS * _EPS)
            cos_ref[...] = dot_acc[...] * lax.rsqrt(denom_sq)

    return kernel


def negative_pearson_loss(x: jax.Array, y: jax.Array,
                          *, tile_b: int = 256, tile_t: int = 1024) -> jax.Array:
    if x.shape != y.shape:
        raise Exception("`x` and `y` MUST have same size!!!")
    if x.ndim != 2:
        raise Exception("`len(x.size())` MUST equal 2!!!")

    B, T = x.shape
    tb = min(tile_b, _round_up(B, 8))      # rows per tile (sublane-aligned)
    tt = min(tile_t, _round_up(T, 128))    # cols per tile (lane-aligned)
    nb = pl.cdiv(B, tb)
    nt = pl.cdiv(T, tt)
    mask_t = (T % tt) != 0

    kernel = _make_kernel(T, tt, mask_t)

    itemsize = jnp.dtype(x.dtype).itemsize
    cost = pl.CostEstimate(
        flops=6 * B * T,                       # 3 muls + 3 adds per element
        transcendentals=B,                     # one rsqrt per row
        bytes_accessed=2 * B * T * itemsize + B * 4,
    )

    cos = pl.pallas_call(
        kernel,
        out_shape=jax.ShapeDtypeStruct((nb * tb, 1), jnp.float32),
        grid_spec=pltpu.PrefetchScalarGridSpec(
            num_scalar_prefetch=0,
            grid=(nb, nt),
            in_specs=[
                pl.BlockSpec((tb, tt), lambda b, t: (b, t)),
                pl.BlockSpec((tb, tt), lambda b, t: (b, t)),
            ],
            out_specs=pl.BlockSpec((tb, 1), lambda b, t: (b, 0)),
            scratch_shapes=[pltpu.VMEM((tb, 1), jnp.float32)] * 3,  # dot, nx, ny
        ),
        compiler_params=pltpu.CompilerParams(
            dimension_semantics=("parallel", "arbitrary"),
        ),
        cost_estimate=cost,
    )(x, y)

    # Padded B rows (if any) are discarded here; mean divides by the true B.
    return 1.0 - jnp.mean(cos[:B, 0])


def _reference(x, y):
    x = x.astype(jnp.float32)
    y = y.astype(jnp.float32)
    dot = jnp.sum(x * y, axis=1)
    denom = jnp.maximum(
        jnp.linalg.norm(x, axis=1) * jnp.linalg.norm(y, axis=1), _EPS
    )
    return 1.0 - jnp.mean(dot / denom)


if __name__ == "__main__":
    key = jax.random.PRNGKey(0)

    # (B, T): aligned, unaligned (B % 8 != 0, T % 128 != 0), multi-T-tile.
    test_shapes = [(8, 128), (10, 200), (16, 1600)]
    for B, T in test_shapes:
        key, kx, ky = jax.random.split(key, 3)
        x = jax.random.normal(kx, (B, T), dtype=jnp.float32)
        y = jax.random.normal(ky, (B, T), dtype=jnp.float32)

        loss = negative_pearson_loss(x, y)
        jax.block_until_ready(loss)

        ref = _reference(x, y)
        assert jnp.allclose(loss, ref, atol=1e-5, rtol=1e-5), (B, T, loss, ref)

    print("KERNEL_OK")
</pallas_src>

<mosaic_0001>
module attributes {stable_mosaic.version = 11 : i64} {
  func.func @kernel(%arg0: i32, %arg1: i32, %arg2: memref<8x128xf32, #tpu.memory_space<vmem>>, %arg3: memref<8x128xf32, #tpu.memory_space<vmem>>, %arg4: memref<8x1xf32, #tpu.memory_space<vmem>>, %arg5: memref<8x1xf32, #tpu.memory_space<vmem>>, %arg6: memref<8x1xf32, #tpu.memory_space<vmem>>, %arg7: memref<8x1xf32, #tpu.memory_space<vmem>>) attributes {dimension_semantics = [#tpu.dimension_semantics<parallel>, #tpu.dimension_semantics<arbitrary>], iteration_bounds = array<i64: 1, 1>, scalar_prefetch = 0 : i64, scratch_operands = 3 : i64, tpu.core_type = #tpu.core_type<tc>, window_params = [{transform_indices = @transform_0, window_bounds = array<i64: 8, 128>}, {transform_indices = @transform_1, window_bounds = array<i64: 8, 128>}, {transform_indices = @transform_2, window_bounds = array<i64: 8, 1>}]} {
    %c0_i32 = arith.constant 0 : i32
    %0 = arith.cmpi eq, %arg1, %c0_i32 : i32
    %1 = arith.extui %0 : i1 to i32
    %c0_i32_0 = arith.constant 0 : i32
    %2 = arith.cmpi ne, %1, %c0_i32_0 : i32
    scf.if %2 {
      %cst_20 = arith.constant 0.000000e+00 : f32
      %26 = vector.broadcast %cst_20 : f32 to vector<8x1xf32>
      %c0_21 = arith.constant 0 : index
      %c0_22 = arith.constant 0 : index
      %27 = vector.load %arg5[%c0_21, %c0_22] : memref<8x1xf32, #tpu.memory_space<vmem>>, vector<8x1xf32>
      tpu.vector_store %arg5[%c0_21, %c0_22], %26 {strides = array<i32>} : memref<8x1xf32, #tpu.memory_space<vmem>>, vector<8x1xf32>,
      %cst_23 = arith.constant 0.000000e+00 : f32
      %28 = vector.broadcast %cst_23 : f32 to vector<8x1xf32>
      %c0_24 = arith.constant 0 : index
      %c0_25 = arith.constant 0 : index
      %29 = vector.load %arg6[%c0_24, %c0_25] : memref<8x1xf32, #tpu.memory_space<vmem>>, vector<8x1xf32>
      tpu.vector_store %arg6[%c0_24, %c0_25], %28 {strides = array<i32>} : memref<8x1xf32, #tpu.memory_space<vmem>>, vector<8x1xf32>,
      %cst_26 = arith.constant 0.000000e+00 : f32
      %30 = vector.broadcast %cst_26 : f32 to vector<8x1xf32>
      %c0_27 = arith.constant 0 : index
      %c0_28 = arith.constant 0 : index
      %31 = vector.load %arg7[%c0_27, %c0_28] : memref<8x1xf32, #tpu.memory_space<vmem>>, vector<8x1xf32>
      tpu.vector_store %arg7[%c0_27, %c0_28], %30 {strides = array<i32>} : memref<8x1xf32, #tpu.memory_space<vmem>>, vector<8x1xf32>,
    } else {
    }
    %c0 = arith.constant 0 : index
    %c0_1 = arith.constant 0 : index
    %3 = vector.load %arg2[%c0, %c0_1] : memref<8x128xf32, #tpu.memory_space<vmem>>, vector<8x128xf32>
    %c0_2 = arith.constant 0 : index
    %c0_3 = arith.constant 0 : index
    %4 = vector.load %arg3[%c0_2, %c0_3] : memref<8x128xf32, #tpu.memory_space<vmem>>, vector<8x128xf32>
    %c0_4 = arith.constant 0 : index
    %c0_5 = arith.constant 0 : index
    %5 = vector.load %arg5[%c0_4, %c0_5] : memref<8x1xf32, #tpu.memory_space<vmem>>, vector<8x1xf32>
    %6 = arith.mulf %3, %4 : vector<8x128xf32>
    %cst = arith.constant dense<0.000000e+00> : vector<8xf32>
    %7 = vector.multi_reduction <add>, %6, %cst [1] : vector<8x128xf32> to vector<8xf32>
    %8 = vector.shape_cast %7 : vector<8xf32> to vector<8x1xf32>
    %9 = arith.addf %5, %8 : vector<8x1xf32>
    %c0_6 = arith.constant 0 : index
    %c0_7 = arith.constant 0 : index
    %10 = vector.load %arg5[%c0_6, %c0_7] : memref<8x1xf32, #tpu.memory_space<vmem>>, vector<8x1xf32>
    tpu.vector_store %arg5[%c0_6, %c0_7], %9 {strides = array<i32>} : memref<8x1xf32, #tpu.memory_space<vmem>>, vector<8x1xf32>,
    %c0_8 = arith.constant 0 : index
    %c0_9 = arith.constant 0 : index
    %11 = vector.load %arg6[%c0_8, %c0_9] : memref<8x1xf32, #tpu.memory_space<vmem>>, vector<8x1xf32>
    %12 = arith.mulf %3, %3 : vector<8x128xf32>
    %cst_10 = arith.constant dense<0.000000e+00> : vector<8xf32>
    %13 = vector.multi_reduction <add>, %12, %cst_10 [1] : vector<8x128xf32> to vector<8xf32>
    %14 = vector.shape_cast %13 : vector<8xf32> to vector<8x1xf32>
    %15 = arith.addf %11, %14 : vector<8x1xf32>
    %c0_11 = arith.constant 0 : index
    %c0_12 = arith.constant 0 : index
    %16 = vector.load %arg6[%c0_11, %c0_12] : memref<8x1xf32, #tpu.memory_space<vmem>>, vector<8x1xf32>
    tpu.vector_store %arg6[%c0_11, %c0_12], %15 {strides = array<i32>} : memref<8x1xf32, #tpu.memory_space<vmem>>, vector<8x1xf32>,
    %c0_13 = arith.constant 0 : index
    %c0_14 = arith.constant 0 : index
    %17 = vector.load %arg7[%c0_13, %c0_14] : memref<8x1xf32, #tpu.memory_space<vmem>>, vector<8x1xf32>
    %18 = arith.mulf %4, %4 : vector<8x128xf32>
    %cst_15 = arith.constant dense<0.000000e+00> : vector<8xf32>
    %19 = vector.multi_reduction <add>, %18, %cst_15 [1] : vector<8x128xf32> to vector<8xf32>
    %20 = vector.shape_cast %19 : vector<8xf32> to vector<8x1xf32>
    %21 = arith.addf %17, %20 : vector<8x1xf32>
    %c0_16 = arith.constant 0 : index
    %c0_17 = arith.constant 0 : index
    %22 = vector.load %arg7[%c0_16, %c0_17] : memref<8x1xf32, #tpu.memory_space<vmem>>, vector<8x1xf32>
    tpu.vector_store %arg7[%c0_16, %c0_17], %21 {strides = array<i32>} : memref<8x1xf32, #tpu.memory_space<vmem>>, vector<8x1xf32>,
    %c0_i32_18 = arith.constant 0 : i32
    %23 = arith.cmpi eq, %arg1, %c0_i32_18 : i32
    %24 = arith.extui %23 : i1 to i32
    %c0_i32_19 = arith.constant 0 : i32
    %25 = arith.cmpi ne, %24, %c0_i32_19 : i32
    scf.if %25 {
      %c0_20 = arith.constant 0 : index
      %c0_21 = arith.constant 0 : index
      %26 = vector.load %arg6[%c0_20, %c0_21] : memref<8x1xf32, #tpu.memory_space<vmem>>, vector<8x1xf32>
      %c0_22 = arith.constant 0 : index
      %c0_23 = arith.constant 0 : index
      %27 = vector.load %arg7[%c0_22, %c0_23] : memref<8x1xf32, #tpu.memory_space<vmem>>, vector<8x1xf32>
      %28 = arith.mulf %26, %27 : vector<8x1xf32>
      %cst_24 = arith.constant 1.000000e-16 : f32
      %29 = vector.broadcast %cst_24 : f32 to vector<8x1xf32>
      %30 = arith.maximumf %28, %29 : vector<8x1xf32>
      %c0_25 = arith.constant 0 : index
      %c0_26 = arith.constant 0 : index
      %31 = vector.load %arg5[%c0_25, %c0_26] : memref<8x1xf32, #tpu.memory_space<vmem>>, vector<8x1xf32>
      %32 = math.rsqrt %30 : vector<8x1xf32>
      %33 = arith.mulf %31, %32 : vector<8x1xf32>
      %c0_27 = arith.constant 0 : index
      %c0_28 = arith.constant 0 : index
      %34 = vector.load %arg4[%c0_27, %c0_28] : memref<8x1xf32, #tpu.memory_space<vmem>>, vector<8x1xf32>
      tpu.vector_store %arg4[%c0_27, %c0_28], %33 {strides = array<i32>} : memref<8x1xf32, #tpu.memory_space<vmem>>, vector<8x1xf32>,
    } else {
    }
    return
  }
  func.func @transform_0(%arg0: i32, %arg1: i32) -> (i32, i32) {
    %c0_i32 = arith.constant 0 : i32
    return %arg0, %arg1 : i32, i32
  }
  func.func @transform_1(%arg0: i32, %arg1: i32) -> (i32, i32) {
    %c0_i32 = arith.constant 0 : i32
    return %arg0, %arg1 : i32, i32
  }
  func.func @transform_2(%arg0: i32, %arg1: i32) -> (i32, i32) {
    %c0_i32 = arith.constant 0 : i32
    %c0_i32_0 = arith.constant 0 : i32
    return %arg0, %c0_i32 : i32, i32
  }
}

</mosaic_0001>

<bundles_post_ra>
// kernel: tpu_custom_call.1
= control target key start
LH: loop header
LB: loop body
LE: loop exit
PB: predicated region body
PF: predicated region fallthrough
CT: control target
= control target key end

     0   :  { %7 = vsyncpa [#allocation6], 0  ;;  %s185_s0 = inlined_call_operand.hbm [shape: f32[8,128], index: 0, kind: input, shape index: {}]   ;;  %s186_s1 = inlined_call_operand.hbm [shape: f32[8,128], index: 1, kind: input, shape index: {}]   ;;  %s187_s2 = inlined_call_operand.vmem [shape: f32[8,1], index: 2, kind: output, shape index: {}]  }
   0x1   :  { %s14_s11 = sshll.u32 %s185_s0, 4  ;;  %s15_s11 = int_to_ptr.hbm [resolvable:$true] %s14_s11 }
   0x2   :  { %8 = vsyncpa [#allocation8], 0  ;;  %s151_s12 = smov [#allocation5]   ;;  %s25_s16 = sshll.u32 %s186_s1, 4  ;;  %s26_s16 = int_to_ptr.hbm [resolvable:$true] %s25_s16 }
   0x3   :  { %s16_s13 = sshll.u32 %s151_s12, 4  ;;  %s152_s17 = smov [#allocation7]   ;;  %s17_s13 = int_to_ptr.vmem [resolvable:$true] %s16_s13 }
   0x4   :  { %19 = dma.hbm_to_vmem [thread:$0]  %s15_s11, 128, %s17_s13, [#allocation6]  }
   0x5   :  { %s27_s18 = sshll.u32 %s152_s17, 4  ;;  %s28_s18 = int_to_ptr.vmem [resolvable:$true] %s27_s18 }
   0x6   :  { %30 = dma.hbm_to_vmem [thread:$0]  %s26_s16, 128, %s28_s18, [#allocation8]  }
   0x7   :  { %147 = dma.done.wait [#allocation6], 128  }
   0x8   :  { %148 = vsyncadd [#allocation6], 4294967168 }
   0x9   :  { %149 = dma.done.wait [#allocation8], 128  }
   0xa   :  { %150 = vsyncadd [#allocation8], 4294967168  ;;  %vm43_vm0 = vcmask 7168   ;;  %v153_v0 = vmov 0.0   ;;  %v47_v1 = vld [vmem:[#allocation5] sm:$0xff]  ;;  %v48_v2 = vld [vmem:[#allocation7] sm:$0xff] }
   0xb   :  { %45 = vst.msk [vmem:[#allocation3] sm:$0xff] %vm43_vm0, %v153_v0  ;;  %v57_v3 = vmul.f32 %v47_v1, %v47_v1  ;;  %v50_v4 = vmul.f32 %v48_v2, %v47_v1  ;;  %v63_v5 = vmul.f32 %v48_v2, %v48_v2 }
   0xc   :  { %44 = vst.msk [vmem:[#allocation2] sm:$0xff] %vm43_vm0, %v153_v0 }
   0xd   :  { %46 = vst.msk [vmem:[#allocation4] sm:$0xff] %vm43_vm0, %v153_v0  ;;  %58 = vadd.xlane.f32.xlu0 %v57_v3  ;;  %51 = vadd.xlane.f32.xlu1 %v50_v4 }
  0x12   :  { %v56_v6 = vld [vmem:[#allocation3] sm:$0xff] }
  0x13   :  { %v49_v7 = vld [vmem:[#allocation2] sm:$0xff] }
  0x14   :  { %v62_v12 = vld [vmem:[#allocation4] sm:$0xff] }
  0x15   :  { %64 = vadd.xlane.f32.xlu0 %v63_v5 }
  0x80   :  { %v59_v8 = vpop.xlane.xlu0 %58  ;;  %v52_v9 = vpop.xlane.xlu1 %51 }
  0x81   :  { %v60_v10 = vadd.f32 %v59_v8, %v56_v6  ;;  %v53_v11 = vadd.f32 %v52_v9, %v49_v7 }
  0x83   :  { %61 = vst.msk [vmem:[#allocation3] sm:$0xff] %vm43_vm0, %v60_v10 }
  0x84   :  { %55 = vst.msk [vmem:[#allocation2] sm:$0xff] %vm43_vm0, %v53_v11 }
  0x88   :  { %v65_v13 = vpop.xlane.xlu0 %64 }
  0x89   :  { %v66_v14 = vadd.f32 %v65_v13, %v62_v12 }
  0x8a   :  { %v71_v15 = vld [vmem:[#allocation3] sm:$0xff] }
  0x8b   :  { %67 = vst.msk [vmem:[#allocation4] sm:$0xff] %vm43_vm0, %v66_v14  ;;  %v75_v24 = vld [vmem:[#allocation2] sm:$0xff] }
  0x92   :  { %v72_v16 = vld [vmem:[#allocation4] sm:$0xff] }
  0x93   :  { %v73_v17 = vmul.f32 %v72_v16, %v71_v15 }
  0x95   :  { %v74_v18 = vmax.f32 %v73_v17, 1e-16 }
  0x97   :  { %97 = vrsqrt.f32 %v74_v18  ;;  %vm82_vm2 = vweird.f32 %v74_v18 }
  0x9d   :  { %v98_v19 = vpop.eup %97 }
  0x9e   :  { %v77_v20 = vmul.f32 %v98_v19, %v74_v18  ;;  %vm83_vm1 = vweird.f32 %v98_v19 }
  0x9f   :  { %vm84_vm3 = vmor %vm82_vm2, %vm83_vm1 }
  0xa0   :  { %v78_v21 = vmul.f32 %v98_v19, %v77_v20 }
  0xa2   :  { %v79_v22 = vmul.f32 0.5, %v78_v21 }
  0xa4   :  { %v80_v23 = vsub.f32 1.5, %v79_v22 }
  0xa6   :  { %v81_v25 = vmul.f32 %v98_v19, %v80_v23 }
  0xa8   :  { %v85_v26 = vsel %vm84_vm3, %v98_v19, %v81_v25 }
  0xa9   :  { %v86_v27 = vmul.f32 %v85_v26, %v75_v24 }
  0xab   :  { %87 = vst.msk [vmem:[%s187_s2] sm:$0xff] %vm43_vm0, %v86_v27 }
  0xac   :  { %92 = vsyncpa [#allocation6], 1 }
  0xad   :  { %93 = vsyncpa [#allocation8], 1 }

</bundles_post_ra>
